<compile_context>
chip_gen: v7x
topology: tpu7x:2x2x1
jax: 0.10.0
libtpu: 0.0.40
codegen_flags: <defaults>
</compile_context>

<pallas_src>
import functools

import jax
import jax.numpy as jnp
from jax import lax
from jax.experimental import pallas as pl
from jax.experimental.pallas import tpu as pltpu


# ----------------------------------------------------------------------------
# Fused kernel: one spatial tile (channel-major) through the whole pipeline.
#   x_ref  : (1, Cin, T)      input tile
#   w1,b1  : (dim, Cin),(dim,1)   mo1 pointwise conv + ReLU
#   we,be  : (dim, dim),(dim,1)   encoder pointwise conv
#   e      : (K, dim)             codebook (for cross term)
#   et     : (dim, K)             codebook transposed (for one-hot gather)
#   e2     : (K, 1)               precomputed ||e_k||^2
#   wd,bd  : (Cin, dim),(Cin,1)   decoder pointwise conv + tanh
# outputs: x_tilde (1,Cin,T), z_e (1,dim,T), z_q (1,dim,T)
# ----------------------------------------------------------------------------
def _vqvae_fused_kernel(x_ref, w1_ref, b1_ref, we_ref, be_ref,
                        e_ref, et_ref, e2_ref, wd_ref, bd_ref,
                        xt_ref, ze_ref, zq_ref):
    x = x_ref[0]                                                    # (Cin, T)

    # mo1: 1x1 conv + ReLU
    res = jnp.dot(w1_ref[...], x, preferred_element_type=jnp.float32)
    res = jnp.maximum(res + b1_ref[...], 0.0)                       # (dim, T)

    # mo2 encoder: 1x1 conv
    z_e = jnp.dot(we_ref[...], res, preferred_element_type=jnp.float32)
    z_e = z_e + be_ref[...]                                         # (dim, T)

    # vector quantization: argmin_k ||z - e_k||^2 == argmin_k (||e_k||^2 - 2 e_k.z)
    cross = jnp.dot(e_ref[...], z_e, preferred_element_type=jnp.float32)  # (K, T)
    d = e2_ref[...] - 2.0 * cross                                   # (K, T)
    K = d.shape[0]
    dmin = jnp.min(d, axis=0, keepdims=True)                        # (1, T)
    iota = lax.broadcasted_iota(jnp.int32, d.shape, 0)              # (K, T)
    # first-occurrence argmin (matches torch.argmin tie-breaking)
    idx = jnp.min(jnp.where(d == dmin, iota, K), axis=0, keepdims=True)
    onehot = (iota == idx).astype(jnp.float32)                      # (K, T)
    z_q = jnp.dot(et_ref[...], onehot, preferred_element_type=jnp.float32)  # (dim, T)

    # mo2 decoder: 1x1 conv + tanh (straight-through copy of z_q in forward)
    x_t = jnp.dot(wd_ref[...], z_q, preferred_element_type=jnp.float32)
    x_t = jnp.tanh(x_t + bd_ref[...])                               # (Cin, T)

    xt_ref[0] = x_t.astype(xt_ref.dtype)
    ze_ref[0] = z_e.astype(ze_ref.dtype)
    zq_ref[0] = z_q.astype(zq_ref.dtype)


def _pick_tile(hw):
    # largest lane-dense tile that evenly divides H*W (keeps VMEM modest even
    # on v7x's 64 MiB); fall back to the full extent for tiny inputs.
    for t in (2048, 1024, 512, 256, 128):
        if hw % t == 0:
            return t
    return hw


# ----------------------------------------------------------------------------
# Parameters (deterministic, channel-major: W is (Cout, Cin), bias is (Cout,1))
# ----------------------------------------------------------------------------
def init_params(key, input_dim, dim, K):
    ks = jax.random.split(key, 4)
    s_in = 1.0 / jnp.sqrt(jnp.float32(input_dim))
    s_d = 1.0 / jnp.sqrt(jnp.float32(dim))
    return {
        # mo1: 1x1 conv input_dim -> dim
        "w1": jax.random.normal(ks[0], (dim, input_dim), jnp.float32) * s_in,
        "b1": jnp.zeros((dim, 1), jnp.float32),
        # mo2 encoder: 1x1 conv dim -> dim
        "we": jax.random.normal(ks[1], (dim, dim), jnp.float32) * s_d,
        "be": jnp.zeros((dim, 1), jnp.float32),
        # codebook: K x dim, uniform(-1/K, 1/K) like nn.Embedding init in VQ-VAE
        "codebook": jax.random.uniform(
            ks[2], (K, dim), jnp.float32, minval=-1.0 / K, maxval=1.0 / K),
        # mo2 decoder: 1x1 conv dim -> input_dim
        "wd": jax.random.normal(ks[3], (input_dim, dim), jnp.float32) * s_d,
        "bd": jnp.zeros((input_dim, 1), jnp.float32),
    }


# ----------------------------------------------------------------------------
# Forward pass: mo1(x) -> mo2(res) -> (x_tilde, z_e_x, z_q_x), all NCHW.
# ----------------------------------------------------------------------------
def vqvae_forward(params, x_nchw):
    B, Cin, H, W = x_nchw.shape
    dim = params["we"].shape[0]
    K = params["codebook"].shape[0]
    HW = H * W

    # NCHW -> (B, C, H*W): a free reshape, already channel-major.
    x_cm = x_nchw.reshape(B, Cin, HW)

    tile = _pick_tile(HW)
    grid = (B, HW // tile)

    e = params["codebook"]
    e_t = e.T                                          # (dim, K)
    e2 = jnp.sum(e * e, axis=1, keepdims=True)         # (K, 1), loop-invariant

    const = lambda b, t: (0, 0)
    row = lambda b, t: (b, 0, t)

    x_tilde, z_e, z_q = pl.pallas_call(
        _vqvae_fused_kernel,
        out_shape=(
            jax.ShapeDtypeStruct((B, Cin, HW), x_nchw.dtype),
            jax.ShapeDtypeStruct((B, dim, HW), x_nchw.dtype),
            jax.ShapeDtypeStruct((B, dim, HW), x_nchw.dtype),
        ),
        grid=grid,
        in_specs=[
            pl.BlockSpec((1, Cin, tile), row),     # x tile
            pl.BlockSpec((dim, Cin), const),       # w1
            pl.BlockSpec((dim, 1), const),         # b1
            pl.BlockSpec((dim, dim), const),       # we
            pl.BlockSpec((dim, 1), const),         # be
            pl.BlockSpec((K, dim), const),         # codebook
            pl.BlockSpec((dim, K), const),         # codebook^T
            pl.BlockSpec((K, 1), const),           # ||e||^2
            pl.BlockSpec((Cin, dim), const),       # wd
            pl.BlockSpec((Cin, 1), const),         # bd
        ],
        out_specs=(
            pl.BlockSpec((1, Cin, tile), row),
            pl.BlockSpec((1, dim, tile), row),
            pl.BlockSpec((1, dim, tile), row),
        ),
        compiler_params=pltpu.CompilerParams(
            dimension_semantics=("parallel", "parallel")),
    )(x_cm, params["w1"], params["b1"], params["we"], params["be"],
      e, e_t, e2, params["wd"], params["bd"])

    # (B, C, H*W) -> NCHW: free reshape, no transpose.
    return (x_tilde.reshape(B, Cin, H, W),
            z_e.reshape(B, dim, H, W),
            z_q.reshape(B, dim, H, W))


if __name__ == "__main__":
    B, input_dim, H, W = 2, 4, 16, 16
    dim, K = 32, 64

    key = jax.random.PRNGKey(0)
    kp, kx = jax.random.split(key)
    params = init_params(kp, input_dim, dim, K)
    x = jax.random.normal(kx, (B, input_dim, H, W), jnp.float32)

    x_tilde, z_e_x, z_q_x = jax.jit(vqvae_forward)(params, x)
    jax.block_until_ready((x_tilde, z_e_x, z_q_x))

    assert x_tilde.shape == (B, input_dim, H, W)
    assert z_e_x.shape == (B, dim, H, W)
    assert z_q_x.shape == (B, dim, H, W)
    assert bool(jnp.all(jnp.isfinite(x_tilde)))
    assert bool(jnp.all(jnp.isfinite(z_e_x)))
    assert bool(jnp.all(jnp.isfinite(z_q_x)))
    print("KERNEL_OK")
</pallas_src>

<mosaic_0001>
module attributes {stable_mosaic.version = 11 : i64} {
  func.func @_vqvae_fused_kernel(%arg0: i32, %arg1: i32, %arg2: memref<1x4x256xf32, #tpu.memory_space<vmem>>, %arg3: memref<32x4xf32, #tpu.memory_space<vmem>>, %arg4: memref<32x1xf32, #tpu.memory_space<vmem>>, %arg5: memref<32x32xf32, #tpu.memory_space<vmem>>, %arg6: memref<32x1xf32, #tpu.memory_space<vmem>>, %arg7: memref<64x32xf32, #tpu.memory_space<vmem>>, %arg8: memref<32x64xf32, #tpu.memory_space<vmem>>, %arg9: memref<64x1xf32, #tpu.memory_space<vmem>>, %arg10: memref<4x32xf32, #tpu.memory_space<vmem>>, %arg11: memref<4x1xf32, #tpu.memory_space<vmem>>, %arg12: memref<1x4x256xf32, #tpu.memory_space<vmem>>, %arg13: memref<1x32x256xf32, #tpu.memory_space<vmem>>, %arg14: memref<1x32x256xf32, #tpu.memory_space<vmem>>) attributes {dimension_semantics = [#tpu.dimension_semantics<parallel>, #tpu.dimension_semantics<parallel>], iteration_bounds = array<i64: 2, 1>, scalar_prefetch = 0 : i64, scratch_operands = 0 : i64, tpu.core_type = #tpu.core_type<tc>, window_params = [{transform_indices = @transform_0, window_bounds = array<i64: 1, 4, 256>}, {pipeline_mode = #tpu.pipeline_mode<synchronous>, transform_indices = @transform_1, window_bounds = array<i64: 32, 4>}, {pipeline_mode = #tpu.pipeline_mode<synchronous>, transform_indices = @transform_2, window_bounds = array<i64: 32, 1>}, {pipeline_mode = #tpu.pipeline_mode<synchronous>, transform_indices = @transform_3, window_bounds = array<i64: 32, 32>}, {pipeline_mode = #tpu.pipeline_mode<synchronous>, transform_indices = @transform_4, window_bounds = array<i64: 32, 1>}, {pipeline_mode = #tpu.pipeline_mode<synchronous>, transform_indices = @transform_5, window_bounds = array<i64: 64, 32>}, {pipeline_mode = #tpu.pipeline_mode<synchronous>, transform_indices = @transform_6, window_bounds = array<i64: 32, 64>}, {pipeline_mode = #tpu.pipeline_mode<synchronous>, transform_indices = @transform_7, window_bounds = array<i64: 64, 1>}, {pipeline_mode = #tpu.pipeline_mode<synchronous>, transform_indices = @transform_8, window_bounds = array<i64: 4, 32>}, {pipeline_mode = #tpu.pipeline_mode<synchronous>, transform_indices = @transform_9, window_bounds = array<i64: 4, 1>}, {transform_indices = @transform_10, window_bounds = array<i64: 1, 4, 256>}, {transform_indices = @transform_11, window_bounds = array<i64: 1, 32, 256>}, {transform_indices = @transform_12, window_bounds = array<i64: 1, 32, 256>}]} {
    %c0 = arith.constant 0 : index
    %c0_0 = arith.constant 0 : index
    %c0_1 = arith.constant 0 : index
    %0 = vector.load %arg2[%c0, %c0_0, %c0_1] : memref<1x4x256xf32, #tpu.memory_space<vmem>>, vector<1x4x256xf32>
    %1 = vector.shape_cast %0 : vector<1x4x256xf32> to vector<4x256xf32>
    %c0_2 = arith.constant 0 : index
    %c0_3 = arith.constant 0 : index
    %2 = vector.load %arg3[%c0_2, %c0_3] : memref<32x4xf32, #tpu.memory_space<vmem>>, vector<32x4xf32>
    %cst = arith.constant dense<0.000000e+00> : vector<32x256xf32>
    %3 = tpu.matmul %2, %1, %cst {dimension_numbers = #tpu.dot_dimension_numbers<[1], [0], [0], [1], [0, 0, 1, 1], [], []>} : vector<32x4xf32>, vector<4x256xf32>, vector<32x256xf32> -> vector<32x256xf32>
    %c0_4 = arith.constant 0 : index
    %c0_5 = arith.constant 0 : index
    %4 = vector.load %arg4[%c0_4, %c0_5] : memref<32x1xf32, #tpu.memory_space<vmem>>, vector<32x1xf32>
    %5 = vector.broadcast %4 : vector<32x1xf32> to vector<32x256xf32>
    %6 = arith.addf %3, %5 : vector<32x256xf32>
    %cst_6 = arith.constant 0.000000e+00 : f32
    %7 = vector.broadcast %cst_6 : f32 to vector<32x256xf32>
    %8 = arith.maximumf %6, %7 : vector<32x256xf32>
    %c0_7 = arith.constant 0 : index
    %c0_8 = arith.constant 0 : index
    %9 = vector.load %arg5[%c0_7, %c0_8] : memref<32x32xf32, #tpu.memory_space<vmem>>, vector<32x32xf32>
    %cst_9 = arith.constant dense<0.000000e+00> : vector<32x256xf32>
    %10 = tpu.matmul %9, %8, %cst_9 {dimension_numbers = #tpu.dot_dimension_numbers<[1], [0], [0], [1], [0, 0, 1, 1], [], []>} : vector<32x32xf32>, vector<32x256xf32>, vector<32x256xf32> -> vector<32x256xf32>
    %c0_10 = arith.constant 0 : index
    %c0_11 = arith.constant 0 : index
    %11 = vector.load %arg6[%c0_10, %c0_11] : memref<32x1xf32, #tpu.memory_space<vmem>>, vector<32x1xf32>
    %12 = vector.broadcast %11 : vector<32x1xf32> to vector<32x256xf32>
    %13 = arith.addf %10, %12 : vector<32x256xf32>
    %c0_12 = arith.constant 0 : index
    %c0_13 = arith.constant 0 : index
    %14 = vector.load %arg7[%c0_12, %c0_13] : memref<64x32xf32, #tpu.memory_space<vmem>>, vector<64x32xf32>
    %cst_14 = arith.constant dense<0.000000e+00> : vector<64x256xf32>
    %15 = tpu.matmul %14, %13, %cst_14 {dimension_numbers = #tpu.dot_dimension_numbers<[1], [0], [0], [1], [0, 0, 1, 1], [], []>} : vector<64x32xf32>, vector<32x256xf32>, vector<64x256xf32> -> vector<64x256xf32>
    %c0_15 = arith.constant 0 : index
    %c0_16 = arith.constant 0 : index
    %16 = vector.load %arg9[%c0_15, %c0_16] : memref<64x1xf32, #tpu.memory_space<vmem>>, vector<64x1xf32>
    %cst_17 = arith.constant 2.000000e+00 : f32
    %17 = vector.broadcast %cst_17 : f32 to vector<64x256xf32>
    %18 = arith.mulf %17, %15 : vector<64x256xf32>
    %19 = vector.broadcast %16 : vector<64x1xf32> to vector<64x256xf32>
    %20 = arith.subf %19, %18 : vector<64x256xf32>
    %cst_18 = arith.constant dense<0x7F800000> : vector<256xf32>
    %21 = vector.multi_reduction <minimumf>, %20, %cst_18 [0] : vector<64x256xf32> to vector<256xf32>
    %22 = vector.shape_cast %21 : vector<256xf32> to vector<1x256xf32>
    %23 = tpu.iota {dimensions = array<i32: 0>} : vector<64x256xi32>
    %24 = vector.broadcast %22 : vector<1x256xf32> to vector<64x256xf32>
    %25 = arith.cmpf oeq, %20, %24 : vector<64x256xf32>
    %c64_i32 = arith.constant 64 : i32
    %26 = vector.broadcast %c64_i32 : i32 to vector<64x256xi32>
    %27 = arith.select %25, %23, %26 : vector<64x256xi1>, vector<64x256xi32>
    %cst_19 = arith.constant dense<2147483647> : vector<256xi32>
    %28 = vector.multi_reduction <minsi>, %27, %cst_19 [0] : vector<64x256xi32> to vector<256xi32>
    %29 = vector.shape_cast %28 : vector<256xi32> to vector<1x256xi32>
    %30 = vector.broadcast %29 : vector<1x256xi32> to vector<64x256xi32>
    %31 = arith.cmpi eq, %23, %30 : vector<64x256xi32>
    %32 = arith.extui %31 : vector<64x256xi1> to vector<64x256xi32>
    %33 = arith.sitofp %32 : vector<64x256xi32> to vector<64x256xf32>
    %c0_20 = arith.constant 0 : index
    %c0_21 = arith.constant 0 : index
    %34 = vector.load %arg8[%c0_20, %c0_21] : memref<32x64xf32, #tpu.memory_space<vmem>>, vector<32x64xf32>
    %cst_22 = arith.constant dense<0.000000e+00> : vector<32x256xf32>
    %35 = tpu.matmul %34, %33, %cst_22 {dimension_numbers = #tpu.dot_dimension_numbers<[1], [0], [0], [1], [0, 0, 1, 1], [], []>} : vector<32x64xf32>, vector<64x256xf32>, vector<32x256xf32> -> vector<32x256xf32>
    %c0_23 = arith.constant 0 : index
    %c0_24 = arith.constant 0 : index
    %36 = vector.load %arg10[%c0_23, %c0_24] : memref<4x32xf32, #tpu.memory_space<vmem>>, vector<4x32xf32>
    %cst_25 = arith.constant dense<0.000000e+00> : vector<4x256xf32>
    %37 = tpu.matmul %36, %35, %cst_25 {dimension_numbers = #tpu.dot_dimension_numbers<[1], [0], [0], [1], [0, 0, 1, 1], [], []>} : vector<4x32xf32>, vector<32x256xf32>, vector<4x256xf32> -> vector<4x256xf32>
    %c0_26 = arith.constant 0 : index
    %c0_27 = arith.constant 0 : index
    %38 = vector.load %arg11[%c0_26, %c0_27] : memref<4x1xf32, #tpu.memory_space<vmem>>, vector<4x1xf32>
    %39 = vector.broadcast %38 : vector<4x1xf32> to vector<4x256xf32>
    %40 = arith.addf %37, %39 : vector<4x256xf32>
    %41 = math.tanh %40 : vector<4x256xf32>
    %c0_28 = arith.constant 0 : index
    %c0_29 = arith.constant 0 : index
    %c0_30 = arith.constant 0 : index
    %42 = vector.load %arg12[%c0_28, %c0_29, %c0_30] : memref<1x4x256xf32, #tpu.memory_space<vmem>>, vector<1x4x256xf32>
    %43 = vector.shape_cast %42 : vector<1x4x256xf32> to vector<4x256xf32>
    %44 = vector.shape_cast %41 : vector<4x256xf32> to vector<1x4x256xf32>
    tpu.vector_store %arg12[%c0_28, %c0_29, %c0_30], %44 {strides = array<i32>} : memref<1x4x256xf32, #tpu.memory_space<vmem>>, vector<1x4x256xf32>,
    %c0_31 = arith.constant 0 : index
    %c0_32 = arith.constant 0 : index
    %c0_33 = arith.constant 0 : index
    %45 = vector.load %arg13[%c0_31, %c0_32, %c0_33] : memref<1x32x256xf32, #tpu.memory_space<vmem>>, vector<1x32x256xf32>
    %46 = vector.shape_cast %45 : vector<1x32x256xf32> to vector<32x256xf32>
    %47 = vector.shape_cast %13 : vector<32x256xf32> to vector<1x32x256xf32>
    tpu.vector_store %arg13[%c0_31, %c0_32, %c0_33], %47 {strides = array<i32>} : memref<1x32x256xf32, #tpu.memory_space<vmem>>, vector<1x32x256xf32>,
    %c0_34 = arith.constant 0 : index
    %c0_35 = arith.constant 0 : index
    %c0_36 = arith.constant 0 : index
    %48 = vector.load %arg14[%c0_34, %c0_35, %c0_36] : memref<1x32x256xf32, #tpu.memory_space<vmem>>, vector<1x32x256xf32>
    %49 = vector.shape_cast %48 : vector<1x32x256xf32> to vector<32x256xf32>
    %50 = vector.shape_cast %35 : vector<32x256xf32> to vector<1x32x256xf32>
    tpu.vector_store %arg14[%c0_34, %c0_35, %c0_36], %50 {strides = array<i32>} : memref<1x32x256xf32, #tpu.memory_space<vmem>>, vector<1x32x256xf32>,
    return
  }
  func.func @transform_0(%arg0: i32, %arg1: i32) -> (i32, i32, i32) {
    %c0_i32 = arith.constant 0 : i32
    %c0_i32_0 = arith.constant 0 : i32
    return %arg0, %c0_i32, %arg1 : i32, i32, i32
  }
  func.func @transform_1(%arg0: i32, %arg1: i32) -> (i32, i32) {
    %c0_i32 = arith.constant 0 : i32
    %c0_i32_0 = arith.constant 0 : i32
    %c0_i32_1 = arith.constant 0 : i32
    return %c0_i32, %c0_i32_0 : i32, i32
  }
  func.func @transform_2(%arg0: i32, %arg1: i32) -> (i32, i32) {
    %c0_i32 = arith.constant 0 : i32
    %c0_i32_0 = arith.constant 0 : i32
    %c0_i32_1 = arith.constant 0 : i32
    return %c0_i32, %c0_i32_0 : i32, i32
  }
  func.func @transform_3(%arg0: i32, %arg1: i32) -> (i32, i32) {
    %c0_i32 = arith.constant 0 : i32
    %c0_i32_0 = arith.constant 0 : i32
    %c0_i32_1 = arith.constant 0 : i32
    return %c0_i32, %c0_i32_0 : i32, i32
  }
  func.func @transform_4(%arg0: i32, %arg1: i32) -> (i32, i32) {
    %c0_i32 = arith.constant 0 : i32
    %c0_i32_0 = arith.constant 0 : i32
    %c0_i32_1 = arith.constant 0 : i32
    return %c0_i32, %c0_i32_0 : i32, i32
  }
  func.func @transform_5(%arg0: i32, %arg1: i32) -> (i32, i32) {
    %c0_i32 = arith.constant 0 : i32
    %c0_i32_0 = arith.constant 0 : i32
    %c0_i32_1 = arith.constant 0 : i32
    return %c0_i32, %c0_i32_0 : i32, i32
  }
  func.func @transform_6(%arg0: i32, %arg1: i32) -> (i32, i32) {
    %c0_i32 = arith.constant 0 : i32
    %c0_i32_0 = arith.constant 0 : i32
    %c0_i32_1 = arith.constant 0 : i32
    return %c0_i32, %c0_i32_0 : i32, i32
  }
  func.func @transform_7(%arg0: i32, %arg1: i32) -> (i32, i32) {
    %c0_i32 = arith.constant 0 : i32
    %c0_i32_0 = arith.constant 0 : i32
    %c0_i32_1 = arith.constant 0 : i32
    return %c0_i32, %c0_i32_0 : i32, i32
  }
  func.func @transform_8(%arg0: i32, %arg1: i32) -> (i32, i32) {
    %c0_i32 = arith.constant 0 : i32
    %c0_i32_0 = arith.constant 0 : i32
    %c0_i32_1 = arith.constant 0 : i32
    return %c0_i32, %c0_i32_0 : i32, i32
  }
  func.func @transform_9(%arg0: i32, %arg1: i32) -> (i32, i32) {
    %c0_i32 = arith.constant 0 : i32
    %c0_i32_0 = arith.constant 0 : i32
    %c0_i32_1 = arith.constant 0 : i32
    return %c0_i32, %c0_i32_0 : i32, i32
  }
  func.func @transform_10(%arg0: i32, %arg1: i32) -> (i32, i32, i32) {
    %c0_i32 = arith.constant 0 : i32
    %c0_i32_0 = arith.constant 0 : i32
    return %arg0, %c0_i32, %arg1 : i32, i32, i32
  }
  func.func @transform_11(%arg0: i32, %arg1: i32) -> (i32, i32, i32) {
    %c0_i32 = arith.constant 0 : i32
    %c0_i32_0 = arith.constant 0 : i32
    return %arg0, %c0_i32, %arg1 : i32, i32, i32
  }
  func.func @transform_12(%arg0: i32, %arg1: i32) -> (i32, i32, i32) {
    %c0_i32 = arith.constant 0 : i32
    %c0_i32_0 = arith.constant 0 : i32
    return %arg0, %c0_i32, %arg1 : i32, i32, i32
  }
}

</mosaic_0001>

<bundles_post_ra>
// kernel: vqvae_forward.1
= control target key start
LH: loop header
LB: loop body
LE: loop exit
PB: predicated region body
PF: predicated region fallthrough
CT: control target
= control target key end

     0   :  { %s1801_s21 = smov 0   ;;  %s1803_s22 = smov 0   ;;  %s2137_s0 = inlined_call_operand.vmem [shape: f32[2,4,256], index: 0, kind: input, shape index: {}]   ;;  %s2138_s1 = inlined_call_operand.vmem [shape: f32[32,4], index: 1, kind: input, shape index: {}]   ;;  %s2139_s2 = inlined_call_operand.vmem [shape: f32[32,1], index: 2, kind: input, shape index: {}]   ;;  %s2140_s3 = inlined_call_operand.vmem [shape: f32[32,32], index: 3, kind: input, shape index: {}]   ;;  %s2141_s4 = inlined_call_operand.vmem [shape: f32[32,1], index: 4, kind: input, shape index: {}]   ;;  %s2142_s5 = inlined_call_operand.vmem [shape: f32[64,32], index: 5, kind: input, shape index: {}]   ;;  %s2143_s6 = inlined_call_operand.vmem [shape: f32[32,64], index: 6, kind: input, shape index: {}]   ;;  %s2144_s7 = inlined_call_operand.vmem [shape: f32[64,1], index: 7, kind: input, shape index: {}]   ;;  %s2145_s8 = inlined_call_operand.vmem [shape: f32[4,32], index: 8, kind: input, shape index: {}]   ;;  %s2146_s9 = inlined_call_operand.vmem [shape: f32[4,1], index: 9, kind: input, shape index: {}]   ;;  %s2147_s10 = inlined_call_operand.vmem [shape: f32[2,4,256], index: 10, kind: output, shape index: {0}]   ;;  %s2148_s11 = inlined_call_operand.vmem [shape: f32[2,32,256], index: 11, kind: output, shape index: {1}]   ;;  %s2149_s12 = inlined_call_operand.vmem [shape: f32[2,32,256], index: 12, kind: output, shape index: {2}]  }
   0x1   :  { %s1805_s23 = smov 0  }
   0x2 LB: > { %s35_s24 = sadd.s32 1, %s1727_s22  ;;  %p1563_p0 = scmp.ge.s32.totalorder %s1731_s23, 1  ;;  %s1731_s23 = sphi %s1805_s23, %s23_s23   ;;  %s1727_s22 = sphi %s1803_s22, %s2153_s22   ;;  %s1723_s21 = sphi %s1801_s21, %s2152_s21  }
   0x3   : > { %p37_p1 = scmp.ge.s32.totalorder %s35_s24, 2  ;;  %p392_p2 = scmp.lt.s32.totalorder %s1731_s23, 3 }
   0x5   : > { %s2155_s24 = smov (%p37_p1, %s35_s24), 0  ;;  %p393_p3 = pnand %p1563_p0, %p392_p2 }
   0x6   : > { %p461_p4 = scmp.lt.s32.totalorder (!%p393_p3), %s1723_s21, 1  ;;  %v1733_v0 = vmov (!%p393_p3), 0.0   ;;  %v505_v1 = vld [vmem:[%s2139_s2] sm:$0xff] (!%p393_p3)  ;;  %v1734_v2 = vmov (!%p393_p3), 0   ;;  %v507_v3 = vld [vmem:[%s2139_s2 + $0x10] sm:$0xff] (!%p393_p3)  ;;  %v506_v4 = vld [vmem:[%s2139_s2 + $0x8] sm:$0xff] (!%p393_p3) }
   0x7   : > { %396 = sbr.rel (%p393_p3) target bundleno = 1254 (0x4e6), region = 60  ;;  %613 = vmatprep.mubr.f32.mxu0 (!%p393_p3), %v1733_v0  ;;  %625 = vmatprep.mubr.f32.mxu1 (!%p393_p3), %v1733_v0  ;;  %v508_v5 = vld [vmem:[%s2139_s2 + $0x18] sm:$0xff] (!%p393_p3)  ;;  %vm544_vm0 = vcmask (!%p393_p3), 1043456   ;;  %v501_v8 = vld [vmem:[%s2138_s1] sm:$0xff] (!%p393_p3)  ;;  %vm531_vm1 = vcmask (!%p393_p3), 31744   ;;  %v503_v9 = vld [vmem:[%s2138_s1 + $0x10] sm:$0xff] (!%p393_p3) }
   0x8   : > { %1702 = vset.pattern.permute.xlu0 (!%p393_p3), %v1734_v2  ;;  %1703 = vset.pattern.permute.xlu1 (!%p393_p3), %v1734_v2  ;;  %v650_v10 = vld [vmem:[%s2141_s4] sm:$0xff] (!%p393_p3)  ;;  %v651_v11 = vld [vmem:[%s2141_s4 + $0x8] sm:$0xff] (!%p393_p3)  ;;  %v504_v13 = vld [vmem:[%s2138_s1 + $0x18] sm:$0xff] (!%p393_p3)  ;;  %vm2150_vm2 = vcmask (!%p393_p3), 261120  }
   0x9   : > { %511 = vperm.xlu0 (!%p393_p3), %1702, %v505_v1   ;;  %521 = vperm.xlu1 (!%p393_p3), %1703, %v507_v3   ;;  %v502_v12 = vld [vmem:[%s2138_s1 + $0x8] sm:$0xff] (!%p393_p3)  ;;  %v652_v14 = vld [vmem:[%s2141_s4 + $0x10] sm:$0xff] (!%p393_p3)  ;;  %v653_v15 = vld [vmem:[%s2141_s4 + $0x18] sm:$0xff] (!%p393_p3) }
   0xa   : > { %v921_v16 = vld [vmem:[%s2144_s7] sm:$0xff] (!%p393_p3)  ;;  %v922_v17 = vld [vmem:[%s2144_s7 + $0x8] sm:$0xff] (!%p393_p3)  ;;  %v923_v18 = vld [vmem:[%s2144_s7 + $0x10] sm:$0xff] (!%p393_p3) }
   0xb   : > { %v924_v19 = vld [vmem:[%s2144_s7 + $0x18] sm:$0xff] (!%p393_p3)  ;;  %v925_v20 = vld [vmem:[%s2144_s7 + $0x20] sm:$0xff] (!%p393_p3)  ;;  %v926_v21 = vld [vmem:[%s2144_s7 + $0x28] sm:$0xff] (!%p393_p3) }
   0xc   : > { %v927_v22 = vld [vmem:[%s2144_s7 + $0x30] sm:$0xff] (!%p393_p3)  ;;  %v928_v23 = vld [vmem:[%s2144_s7 + $0x38] sm:$0xff] (!%p393_p3)  ;;  %v1269_v24 = vld [vmem:[%s2146_s9] sm:$0xf] (!%p393_p3) }
   0xd   : > { %516 = vperm.xlu0 (!%p393_p3), %1702, %v506_v4   ;;  %526 = vperm.xlu1 (!%p393_p3), %1703, %v508_v5   ;;  %v646_v57 = vld [vmem:[%s2140_s3] sm:$0xff] (!%p393_p3)  ;;  %v647_v58 = vld [vmem:[%s2140_s3 + $0x8] sm:$0xff] (!%p393_p3)  ;;  %v648_v59 = vld [vmem:[%s2140_s3 + $0x10] sm:$0xff] (!%p393_p3) }
   0xe   : > { %s2157_s21 = smov (!%p461_p4, %s1723_s21), 1  ;;  %v649_v60 = vld [vmem:[%s2140_s3 + $0x18] sm:$0xff] }
   0xf   : > { %s1629_s29 = sshll.u32 %s2157_s21, 3  ;;  %s1631_s26 = sshll.u32 %s2157_s21, 6 }
  0x10   : > { %s468_s18 = scalar_lea.vmem %s2137_s0, %s1629_s29  ;;  %s1926_s30 = scalar_lea.vmem %s2148_s11, %s1631_s26 }
  0x11   : > { %v500_v6 = vld [vmem:[%s468_s18] sm:$0xff]  ;;  %656 = vperm.xlu0 %1702, %v650_v10   ;;  %661 = vperm.xlu1 %1703, %v651_v11   ;;  %s498_s15 = scalar_lea.vmem %s2149_s12, %s1631_s26  ;;  %s478_s19 = scalar_lea.vmem %s2147_s10, %s1629_s29 }
  0x12   : > { %v530_v7 = vcombine.high %v500_v6, %v500_v6 }
  0x14   : > { %1572 = vmatprep.subr.msk.mxu0 %vm544_vm0, %v530_v7  ;;  %1673 = vmatprep.subr.msk.mxu1 %vm544_vm0, %v530_v7 }
  0x15   : > { %1573 = vmatpush1.msk.msra.mxu0 %vm544_vm0, %v500_v6  ;;  %1674 = vmatpush1.msk.msra.mxu1 %vm544_vm0, %v500_v6 }
  0x16   : > { %1574 = vmatmul.mubr.msk.f32.vlgmr.msra.gmra.mrb[0].mxu0 %vm531_vm1, %v501_v8  ;;  %1576 = vmatmul.mubr.msk.f32.vlgmr.msra.gmra.mrb[0].mxu1 %vm531_vm1, %v503_v9 }
  0x17   : > { %619 = vmatprep.mubr.f32.mxu0 %v1733_v0  ;;  %631 = vmatprep.mubr.f32.mxu1 %v1733_v0 }
  0x18   : > { %666 = vperm.xlu0 %1702, %v652_v14   ;;  %671 = vperm.xlu1 %1703, %v653_v15  }
  0x1a   : > { %1575 = vmatmul.mubr.msk.f32.gmra.mrb[2].mxu0 %vm531_vm1, %v502_v12  ;;  %1577 = vmatmul.mubr.msk.f32.gmra.mrb[2].mxu1 %vm531_vm1, %v504_v13 }
  0x1b   : > { %751 = vmatprep.mubr.f32.mxu1 %v1733_v0  ;;  %872 = vmatprep.mubr.f32.mxu0 %v1733_v0 }
  0x1c   : > { %947 = vperm.xlu0 %1702, %v921_v16   ;;  %952 = vperm.xlu1 %1703, %v922_v17  }
  0x20   : > { %957 = vperm.xlu0 %1702, %v923_v18   ;;  %962 = vperm.xlu1 %1703, %v924_v19  }
  0x24   : > { %967 = vperm.xlu0 %1702, %v925_v20   ;;  %972 = vperm.xlu1 %1703, %v926_v21  }
  0x28   : > { %977 = vperm.xlu0 %1702, %v927_v22   ;;  %982 = vperm.xlu1 %1703, %v928_v23   ;;  %v776_v22 = vld [vmem:[%s2142_s5] sm:$0xff]  ;;  %v777_v23 = vld [vmem:[%s2142_s5 + $0x8] sm:$0xff] }
  0x2c   : > { %1272 = vperm.xlu0 %1702, %v1269_v24   ;;  %v778_v24 = vld [vmem:[%s2142_s5 + $0x10] sm:$0xff] }
  0x88   : > { %v512_v25 = vpop.permute.xlu0 %511  ;;  %v522_v26 = vpop.permute.xlu1 %521 }
  0x8c   : > { %v517_v33 = vpop.permute.xlu0 %516  ;;  %v527_v34 = vpop.permute.xlu1 %526 }
  0x90   : > { %v657_v61 = vpop.permute.xlu0 %656  ;;  %v662_v3 = vpop.permute.xlu1 %661 }
  0x97   : > { %v667_v9 = vpop.permute.xlu0 %666  ;;  %v672_v15 = vpop.permute.xlu1 %671 }
  0xe9   : > { %v615_v27 = vpop.f32.mrb[0].mxu0  ;;  %v627_v28 = vpop.f32.mrb[0].mxu1 }
  0xea   : > { %v617_v29 = vpop.f32.mrb[1].mxu0  ;;  %v628_v30 = vadd.f32 %v627_v28, %v522_v26  ;;  %v629_v31 = vpop.f32.mrb[1].mxu1  ;;  %v616_v35 = vadd.f32 %v615_v27, %v512_v25  ;;  %v781_v27 = vld [vmem:[%s2142_s5 + $0x28] sm:$0xff]  ;;  %v782_v28 = vld [vmem:[%s2142_s5 + $0x30] sm:$0xff] }
  0xeb   : > { %v630_v32 = vadd.f32 %v629_v31, %v522_v26  ;;  %v618_v36 = vadd.f32 %v617_v29, %v512_v25  ;;  %v779_v25 = vld [vmem:[%s2142_s5 + $0x18] sm:$0xff]  ;;  %v780_v26 = vld [vmem:[%s2142_s5 + $0x20] sm:$0xff] }
  0xec   : > { %v642_v39 = vmax.f32 %v628_v30, 0.0  ;;  %v638_v47 = vmax.f32 %v616_v35, 0.0  ;;  %v783_v29 = vld [vmem:[%s2142_s5 + $0x38] sm:$0xff] }
  0xed   : > { %v621_v37 = vpop.f32.mrb[2].mxu0  ;;  %v633_v38 = vpop.f32.mrb[2].mxu1  ;;  %v643_v44 = vmax.f32 %v630_v32, 0.0  ;;  %v639_v50 = vmax.f32 %v618_v36, 0.0 }
  0xee   : > { %v622_v40 = vadd.f32 %v621_v37, %v517_v33  ;;  %v634_v41 = vadd.f32 %v633_v38, %v527_v34  ;;  %v623_v42 = vpop.f32.mrb[3].mxu0  ;;  %v635_v43 = vpop.f32.mrb[3].mxu1 }
  0xef   : > { %v624_v45 = vadd.f32 %v623_v42, %v517_v33  ;;  %v636_v46 = vadd.f32 %v635_v43, %v527_v34  ;;  %v948_v32 = vpop.permute.xlu0 %947  ;;  %v953_v36 = vpop.permute.xlu1 %952 }
  0xf0   : > { %v640_v48 = vmax.f32 %v622_v40, 0.0  ;;  %v644_v49 = vmax.f32 %v634_v41, 0.0 }
  0xf1   : > { %v641_v51 = vmax.f32 %v624_v45, 0.0  ;;  %v645_v52 = vmax.f32 %v636_v46, 0.0 }
  0xf2   : > { %v1635_v53 = vpack.c.bf16 %v640_v48, %v638_v47  ;;  %v1639_v54 = vpack.c.bf16 %v644_v49, %v642_v39 }
  0xf3   : > { %v1633_v55 = vpack.c.bf16 %v641_v51, %v639_v50  ;;  %v1637_v56 = vpack.c.bf16 %v645_v52, %v643_v44  ;;  %v958_v41 = vpop.permute.xlu0 %957 }
  0xf5   : > { %1634 = vmatprep.subr.bf16.mxu1 %v1633_v55 }
  0xf6   : > { %1636 = vmatpush1.bf16.msra.mxu1 %v1635_v53  ;;  %v963_v53 = vpop.permute.xlu1 %962 }
  0xf7   : > { %1638 = vmatprep.subr.bf16.mxu1 %v1637_v56 }
  0xfa   : > { %1640 = vmatpush1.bf16.msra.mxu1 %v1639_v54 }
  0xfd   : > { %1578 = vmatmul.mubr.msk.f32.vlgmr.msra.gmra.mrb[4].mxu1 %vm2150_vm2, %v646_v57 }
  0xfe   : > { %757 = vmatprep.mubr.f32.mxu1 %v1733_v0 }
 0x101   : > { %1579 = vmatmul.mubr.msk.f32.gmra.mrb[6].mxu1 %vm2150_vm2, %v647_v58 }
 0x102   : > { %763 = vmatprep.mubr.f32.mxu1 %v1733_v0 }
 0x105   : > { %1580 = vmatmul.mubr.msk.f32.gmra.mrb[8].mxu1 %vm2150_vm2, %v648_v59 }
 0x106   : > { %769 = vmatprep.mubr.f32.mxu1 %v1733_v0 }
 0x109   : > { %1581 = vmatmul.mubr.msk.f32.gmra.mrb[10].mxu1 %vm2150_vm2, %v649_v60 }
 0x10a   : > { %1243 = vmatprep.mubr.f32.mxu1 %v1733_v0 }
 0x1d0   : > { %v753_v62 = vpop.f32.mrb[4].mxu1 }
 0x1d1   : > { %v754_v63 = vadd.f32 %v753_v62, %v657_v61  ;;  %v755_v1 = vpop.f32.mrb[5].mxu1 }
 0x1d2   : > { %v756_v2 = vadd.f32 %v755_v1, %v657_v61  ;;  %v968_v1 = vpop.permute.xlu0 %967 }
 0x1d3   : > { %1356 = vst [vmem:[%s1926_s30] sm:$0xff] %v754_v63 }
 0x1d4   : > { %1357 = vst [vmem:[%s1926_s30 + $0x8] sm:$0xff] %v756_v2  ;;  %v759_v4 = vpop.f32.mrb[6].mxu1 }
 0x1d5   : > { %v760_v5 = vadd.f32 %v759_v4, %v662_v3  ;;  %v761_v6 = vpop.f32.mrb[7].mxu1 }
 0x1d6   : > { %v762_v7 = vadd.f32 %v761_v6, %v662_v3 }
 0x1d7   : > { %v1643_v8 = vpack.c.bf16 %v760_v5, %v754_v63  ;;  %1358 = vst [vmem:[%s1926_s30 + $0x10] sm:$0xff] %v760_v5 }
 0x1d8   : > { %v1641_v10 = vpack.c.bf16 %v762_v7, %v756_v2  ;;  %1359 = vst [vmem:[%s1926_s30 + $0x18] sm:$0xff] %v762_v7  ;;  %v765_v11 = vpop.f32.mrb[8].mxu1 }
 0x1d9   : > { %v766_v12 = vadd.f32 %v765_v11, %v667_v9  ;;  %v767_v13 = vpop.f32.mrb[9].mxu1 }
 0x1da   : > { %v768_v14 = vadd.f32 %v767_v13, %v667_v9  ;;  %1642 = vmatprep.subr.bf16.mxu0 %v1641_v10  ;;  %v973_v10 = vpop.permute.xlu1 %972 }
 0x1db   : > { %1360 = vst [vmem:[%s1926_s30 + $0x20] sm:$0xff] %v766_v12  ;;  %1644 = vmatpush1.bf16.msra.mxu0 %v1643_v8 }
 0x1dc   : > { %1361 = vst [vmem:[%s1926_s30 + $0x28] sm:$0xff] %v768_v14  ;;  %v771_v16 = vpop.f32.mrb[10].mxu1 }
 0x1dd   : > { %v772_v17 = vadd.f32 %v771_v16, %v672_v15  ;;  %v773_v18 = vpop.f32.mrb[11].mxu1 }
 0x1de   : > { %v774_v19 = vadd.f32 %v773_v18, %v672_v15 }
 0x1df   : > { %v1647_v20 = vpack.c.bf16 %v772_v17, %v766_v12  ;;  %1362 = vst [vmem:[%s1926_s30 + $0x30] sm:$0xff] %v772_v17 }
 0x1e0   : > { %v1645_v21 = vpack.c.bf16 %v774_v19, %v768_v14  ;;  %1363 = vst [vmem:[%s1926_s30 + $0x38] sm:$0xff] %v774_v19  ;;  %v978_v19 = vpop.permute.xlu0 %977 }
 0x1e2   : > { %1646 = vmatprep.subr.bf16.mxu0 %v1645_v21 }
 0x1e3   : > { %1648 = vmatpush1.bf16.msra.mxu0 %v1647_v20 }
 0x1e6   : > { %1582 = vmatmul.mubr.msk.f32.vlgmr.msra.gmra.mrb[4].mxu0 %vm2150_vm2, %v776_v22 }
 0x1e7   : > { %878 = vmatprep.mubr.f32.mxu0 %v1733_v0 }
 0x1ea   : > { %1583 = vmatmul.mubr.msk.f32.gmra.mrb[6].mxu0 %vm2150_vm2, %v777_v23 }
 0x1eb   : > { %884 = vmatprep.mubr.f32.mxu0 %v1733_v0 }
 0x1ee   : > { %1584 = vmatmul.mubr.msk.f32.gmra.mrb[8].mxu0 %vm2150_vm2, %v778_v24 }
 0x1ef   : > { %890 = vmatprep.mubr.f32.mxu0 %v1733_v0 }
 0x1f2   : > { %1585 = vmatmul.mubr.msk.f32.gmra.mrb[10].mxu0 %vm2150_vm2, %v779_v25 }
 0x1f3   : > { %896 = vmatprep.mubr.f32.mxu0 %v1733_v0 }
 0x1f6   : > { %1586 = vmatmul.mubr.msk.f32.gmra.mrb[12].mxu0 %vm2150_vm2, %v780_v26 }
 0x1f7   : > { %902 = vmatprep.mubr.f32.mxu0 %v1733_v0 }
 0x1fa   : > { %1587 = vmatmul.mubr.msk.f32.gmra.mrb[14].mxu0 %vm2150_vm2, %v781_v27 }
 0x1fb   : > { %908 = vmatprep.mubr.f32.mxu0 %v1733_v0 }
 0x1fe   : > { %1588 = vmatmul.mubr.msk.f32.gmra.mrb[16].mxu0 %vm2150_vm2, %v782_v28  ;;  %v983_v28 = vpop.permute.xlu1 %982 }
 0x1ff   : > { %914 = vmatprep.mubr.f32.mxu0 %v1733_v0 }
 0x202   : > { %1589 = vmatmul.mubr.msk.f32.gmra.mrb[18].mxu0 %vm2150_vm2, %v783_v29 }
 0x2b9   : > { %v874_v30 = vpop.f32.mrb[4].mxu0 }
 0x2ba   : > { %v876_v31 = vpop.f32.mrb[5].mxu0  ;;  %v929_v35 = vmul.f32 2.0, %v874_v30 }
 0x2bb   : > { %v930_v37 = vmul.f32 2.0, %v876_v31 }
 0x2bc   : > { %v1975_v43 = vsub.f32 %v948_v32, %v929_v35 }
 0x2bd   : > { %v880_v33 = vpop.f32.mrb[6].mxu0  ;;  %v1979_v46 = vsub.f32 %v948_v32, %v930_v37 }
 0x2be   : > { %v882_v34 = vpop.f32.mrb[7].mxu0  ;;  %v931_v44 = vmul.f32 2.0, %v880_v33 }
 0x2bf   : > { %v932_v47 = vmul.f32 2.0, %v882_v34 }
 0x2c0   : > { %v1987_v56 = vsub.f32 %v953_v36, %v931_v44 }
 0x2c1   : > { %v886_v38 = vpop.f32.mrb[8].mxu0  ;;  %v1991_v58 = vsub.f32 %v953_v36, %v932_v47 }
 0x2c2   : > { %v933_v39 = vmul.f32 2.0, %v886_v38  ;;  %v888_v40 = vpop.f32.mrb[9].mxu0  ;;  %v1027_v38 = vlaneseq }
 0x2c3   : > { %v934_v42 = vmul.f32 2.0, %v888_v40 }
 0x2c4   : > { %v1977_v45 = vsub.f32 %v958_v41, %v933_v39  ;;  %v2014_v44 = vshrl.u32 %v1027_v38, 7  ;;  %v1162_v38 = vld [vmem:[%s2143_s6] sm:$0xff] }
 0x2c5   : > { %v1981_v48 = vsub.f32 %v958_v41, %v934_v42  ;;  %v892_v49 = vpop.f32.mrb[10].mxu0 }
 0x2c6   : > { %v1001_v50 = vmin.f32 %v1975_v43, %v1977_v45  ;;  %v935_v51 = vmul.f32 2.0, %v892_v49  ;;  %v894_v52 = vpop.f32.mrb[11].mxu0 }
 0x2c7   : > { %v1014_v54 = vmin.f32 %v1979_v46, %v1981_v48  ;;  %v936_v55 = vmul.f32 2.0, %v894_v52  ;;  %v2017_v52 = vadd.s32 8, %v2014_v44 }
 0x2c8   : > { %v1989_v57 = vsub.f32 %v963_v53, %v935_v51 }
 0x2c9   : > { %v1993_v59 = vsub.f32 %v963_v53, %v936_v55  ;;  %v898_v60 = vpop.f32.mrb[12].mxu0  ;;  %v2020_v55 = vadd.s32 16, %v2014_v44 }
 0x2ca   : > { %v1002_v61 = vmin.f32 %v1987_v56, %v1989_v57  ;;  %v937_v62 = vmul.f32 2.0, %v898_v60  ;;  %v900_v63 = vpop.f32.mrb[13].mxu0  ;;  %v2023_v60 = vadd.s32 24, %v2014_v44 }
 0x2cb   : > { %v1015_v2 = vmin.f32 %v1991_v58, %v1993_v59  ;;  %v938_v3 = vmul.f32 2.0, %v900_v63  ;;  %v2032_v63 = vadd.s32 48, %v2014_v44 }
 0x2cc   : > { %v1999_v4 = vsub.f32 %v968_v1, %v937_v62  ;;  %v2029_v62 = vadd.s32 40, %v2014_v44 }
 0x2cd   : > { %v2001_v5 = vsub.f32 %v968_v1, %v938_v3  ;;  %v904_v6 = vpop.f32.mrb[14].mxu0  ;;  %v2035_v1 = vadd.s32 56, %v2014_v44 }
 0x2ce   : > { %v1003_v7 = vmin.f32 %v1001_v50, %v1999_v4  ;;  %v939_v8 = vmul.f32 2.0, %v904_v6  ;;  %v906_v9 = vpop.f32.mrb[15].mxu0 }
 0x2cf   : > { %v1016_v11 = vmin.f32 %v1014_v54, %v2001_v5  ;;  %v940_v12 = vmul.f32 2.0, %v906_v9 }
 0x2d0   : > { %v995_v13 = vsub.f32 %v973_v10, %v939_v8 }
 0x2d1   : > { %v2005_v14 = vsub.f32 %v973_v10, %v940_v12  ;;  %v910_v15 = vpop.f32.mrb[16].mxu0 }
 0x2d2   : > { %v1004_v16 = vmin.f32 %v1002_v61, %v995_v13  ;;  %v941_v17 = vmul.f32 2.0, %v910_v15  ;;  %v912_v18 = vpop.f32.mrb[17].mxu0  ;;  %v2026_v61 = vadd.s32 32, %v2014_v44 }
 0x2d3   : > { %v1017_v20 = vmin.f32 %v1015_v2, %v2005_v14  ;;  %v942_v21 = vmul.f32 2.0, %v912_v18 }
 0x2d4   : > { %v997_v22 = vsub.f32 %v978_v19, %v941_v17 }
 0x2d5   : > { %v2008_v23 = vsub.f32 %v978_v19, %v942_v21  ;;  %v916_v24 = vpop.f32.mrb[18].mxu0 }
 0x2d6   : > { %v1005_v25 = vmin.f32 %v1003_v7, %v997_v22  ;;  %v943_v26 = vmul.f32 2.0, %v916_v24  ;;  %v918_v27 = vpop.f32.mrb[19].mxu0 }
 0x2d7   : > { %v1018_v29 = vmin.f32 %v1016_v11, %v2008_v23  ;;  %v944_v30 = vmul.f32 2.0, %v918_v27 }
 0x2d8   : > { %v999_v31 = vsub.f32 %v983_v28, %v943_v26 }
 0x2d9   : > { %v2011_v32 = vsub.f32 %v983_v28, %v944_v30 }
 0x2da   : > { %v1006_v33 = vmin.f32 %v1004_v16, %v999_v31 }
 0x2db   : > { %v1019_v34 = vmin.f32 %v1017_v20, %v2011_v32 }
 0x2dc   : > { %v1007_v35 = vmin.f32 %v1005_v25, %v1006_v33 }
 0x2dd   : > { %v1020_v36 = vmin.f32 %v1018_v29, %v1019_v34 }
 0x2de   : > { %v1008_v37 = vrot.slane %v1007_v35, 4 }
 0x2df   : > { %v1021_v39 = vrot.slane %v1020_v36, 4 }
 0x2e0   : > { %v1009_v40 = vmin.f32 %v1007_v35, %v1008_v37  ;;  %v1735_v37 = vmov 1.0|1.0  }
 0x2e1   : > { %v1022_v41 = vmin.f32 %v1020_v36, %v1021_v39  ;;  %v1163_v39 = vld [vmem:[%s2143_s6 + $0x8] sm:$0xff] }
 0x2e2   : > { %v1010_v42 = vrot.slane %v1009_v40, 2 }
 0x2e3   : > { %v1023_v47 = vrot.slane %v1022_v41, 2 }
 0x2e4   : > { %v1011_v49 = vmin.f32 %v1009_v40, %v1010_v42  ;;  %v1164_v40 = vld [vmem:[%s2143_s6 + $0x10] sm:$0xff] }
 0x2e5   : > { %v1024_v50 = vmin.f32 %v1022_v41, %v1023_v47  ;;  %v1165_v41 = vld [vmem:[%s2143_s6 + $0x18] sm:$0xff] }
 0x2e6   : > { %v1012_v51 = vrot.slane %v1011_v49, 1 }
 0x2e7   : > { %v1025_v53 = vrot.slane %v1024_v50, 1 }
 0x2e8   : > { %v1013_v54 = vmin.f32 %v1011_v49, %v1012_v51 }
 0x2e9   : > { %v1026_v2 = vmin.f32 %v1024_v50, %v1025_v53 }
 0x2ea   : > { %vm1036_vm3 = vcmp.eq.f32.partialorder %v1975_v43, %v1013_v54  ;;  %vm1038_vm4 = vcmp.eq.f32.partialorder %v1987_v56, %v1013_v54  ;;  %vm1040_vm5 = vcmp.eq.f32.partialorder %v1977_v45, %v1013_v54  ;;  %vm1042_vm6 = vcmp.eq.f32.partialorder %v1989_v57, %v1013_v54 }
 0x2eb   : > { %vm1044_vm7 = vcmp.eq.f32.partialorder %v1999_v4, %v1013_v54  ;;  %vm1046_vm8 = vcmp.eq.f32.partialorder %v995_v13, %v1013_v54  ;;  %vm1048_vm9 = vcmp.eq.f32.partialorder %v997_v22, %v1013_v54  ;;  %vm1050_vm10 = vcmp.eq.f32.partialorder %v999_v31, %v1013_v54 }
 0x2ec   : > { %v1052_v3 = vsel %vm1036_vm3, %v2014_v44, 64  ;;  %v1054_v6 = vsel %vm1038_vm4, %v2017_v52, 64  ;;  %v1056_v7 = vsel %vm1040_vm5, %v2020_v55, 64  ;;  %v1058_v8 = vsel %vm1042_vm6, %v2023_v60, 64 }
 0x2ed   : > { %v1060_v43 = vsel %vm1044_vm7, %v2026_v61, 64  ;;  %v1062_v56 = vsel %vm1046_vm8, %v2029_v62, 64  ;;  %v1064_v45 = vsel %vm1048_vm9, %v2032_v63, 64  ;;  %v1066_v57 = vsel %vm1050_vm10, %v2035_v1, 64 }
 0x2ee   : > { %vm1068_vm11 = vcmp.lt.s32.totalorder %v1052_v3, %v1056_v7  ;;  %vm1070_vm12 = vcmp.lt.s32.totalorder %v1054_v6, %v1058_v8  ;;  %vm1037_vm13 = vcmp.eq.f32.partialorder %v1979_v46, %v1026_v2  ;;  %vm1039_vm14 = vcmp.eq.f32.partialorder %v1991_v58, %v1026_v2 }
 0x2ef   : > { %v1069_v4 = vsel %vm1068_vm11, %v1052_v3, %v1056_v7  ;;  %v1071_v9 = vsel %vm1070_vm12, %v1054_v6, %v1058_v8  ;;  %vm1041_vm15 = vcmp.eq.f32.partialorder %v1981_v48, %v1026_v2  ;;  %vm1043_vm0 = vcmp.eq.f32.partialorder %v1993_v59, %v1026_v2 }
 0x2f0   : > { %vm1072_vm1 = vcmp.lt.s32.totalorder %v1069_v4, %v1060_v43  ;;  %vm1074_vm3 = vcmp.lt.s32.totalorder %v1071_v9, %v1062_v56  ;;  %vm1045_vm4 = vcmp.eq.f32.partialorder %v2001_v5, %v1026_v2  ;;  %vm1047_vm5 = vcmp.eq.f32.partialorder %v2005_v14, %v1026_v2 }
 0x2f1   : > { %v1073_v10 = vsel %vm1072_vm1, %v1069_v4, %v1060_v43  ;;  %v1075_v11 = vsel %vm1074_vm3, %v1071_v9, %v1062_v56  ;;  %vm1049_vm6 = vcmp.eq.f32.partialorder %v2008_v23, %v1026_v2  ;;  %vm1051_vm7 = vcmp.eq.f32.partialorder %v2011_v32, %v1026_v2 }
 0x2f2   : > { %vm1076_vm8 = vcmp.lt.s32.totalorder %v1073_v10, %v1064_v45  ;;  %vm1078_vm9 = vcmp.lt.s32.totalorder %v1075_v11, %v1066_v57  ;;  %v1053_v12 = vsel %vm1037_vm13, %v2014_v44, 64  ;;  %v1055_v13 = vsel %vm1039_vm14, %v2017_v52, 64 }
 0x2f3   : > { %v1077_v15 = vsel %vm1076_vm8, %v1073_v10, %v1064_v45  ;;  %v1079_v16 = vsel %vm1078_vm9, %v1075_v11, %v1066_v57  ;;  %v1057_v17 = vsel %vm1041_vm15, %v2020_v55, 64  ;;  %v1059_v18 = vsel %vm1043_vm0, %v2023_v60, 64 }
 0x2f4   : > { %vm1080_vm10 = vcmp.lt.s32.totalorder %v1077_v15, %v1079_v16  ;;  %v1061_v46 = vsel %vm1045_vm4, %v2026_v61, 64  ;;  %vm1091_vm11 = vcmp.lt.s32.totalorder %v1053_v12, %v1057_v17  ;;  %vm1093_vm12 = vcmp.lt.s32.totalorder %v1055_v13, %v1059_v18 }
 0x2f5   : > { %v1081_v19 = vsel %vm1080_vm10, %v1077_v15, %v1079_v16  ;;  %v1063_v20 = vsel %vm1047_vm5, %v2029_v62, 64  ;;  %v1092_v21 = vsel %vm1091_vm11, %v1053_v12, %v1057_v17  ;;  %v1094_v48 = vsel %vm1093_vm12, %v1055_v13, %v1059_v18 }
 0x2f6   : > { %v1082_v58 = vrot.slane %v1081_v19, 4  ;;  %v1065_v59 = vsel %vm1049_vm6, %v2032_v63, 64  ;;  %vm1095_vm13 = vcmp.lt.s32.totalorder %v1092_v21, %v1061_v46  ;;  %vm1097_vm14 = vcmp.lt.s32.totalorder %v1094_v48, %v1063_v20 }
 0x2f7   : > { %v1067_v5 = vsel %vm1051_vm7, %v2035_v1, 64  ;;  %v1096_v22 = vsel %vm1095_vm13, %v1092_v21, %v1061_v46  ;;  %v1098_v24 = vsel %vm1097_vm14, %v1094_v48, %v1063_v20 }
 0x2f8   : > { %vm1083_vm15 = vcmp.lt.s32.totalorder %v1081_v19, %v1082_v58  ;;  %vm1099_vm0 = vcmp.lt.s32.totalorder %v1096_v22, %v1065_v59  ;;  %vm1101_vm1 = vcmp.lt.s32.totalorder %v1098_v24, %v1067_v5 }
 0x2f9   : > { %v1084_v25 = vsel %vm1083_vm15, %v1081_v19, %v1082_v58  ;;  %v1100_v26 = vsel %vm1099_vm0, %v1096_v22, %v1065_v59  ;;  %v1102_v27 = vsel %vm1101_vm1, %v1098_v24, %v1067_v5 }
 0x2fa   : > { %v1085_v14 = vrot.slane %v1084_v25, 2  ;;  %vm1103_vm3 = vcmp.lt.s32.totalorder %v1100_v26, %v1102_v27 }
 0x2fb   : > { %v1104_v28 = vsel %vm1103_vm3, %v1100_v26, %v1102_v27 }
 0x2fc   : > { %vm1086_vm4 = vcmp.lt.s32.totalorder %v1084_v25, %v1085_v14  ;;  %v1105_v29 = vrot.slane %v1104_v28, 4 }
 0x2fd   : > { %v1087_v23 = vsel %vm1086_vm4, %v1084_v25, %v1085_v14 }
 0x2fe   : > { %v1088_v30 = vrot.slane %v1087_v23, 1  ;;  %vm1106_vm5 = vcmp.lt.s32.totalorder %v1104_v28, %v1105_v29 }
 0x2ff   : > { %v1107_v31 = vsel %vm1106_vm5, %v1104_v28, %v1105_v29 }
 0x300   : > { %v1108_v33 = vrot.slane %v1107_v31, 2  ;;  %vm1089_vm6 = vcmp.lt.s32.totalorder %v1087_v23, %v1088_v30 }
 0x301   : > { %v1090_v34 = vsel %vm1089_vm6, %v1087_v23, %v1088_v30 }
 0x302   : > { %vm1109_vm8 = vcmp.lt.s32.totalorder %v1107_v31, %v1108_v33  ;;  %vm1114_vm9 = vcmp.eq.s32.totalorder %v2014_v44, %v1090_v34  ;;  %vm1116_vm10 = vcmp.eq.s32.totalorder %v2017_v52, %v1090_v34  ;;  %vm1118_vm3 = vcmp.eq.s32.totalorder %v2020_v55, %v1090_v34 }
 0x303   : > { %v1110_v32 = vsel %vm1109_vm8, %v1107_v31, %v1108_v33  ;;  %vm1651_vm0 = vmpackc.low %vm1116_vm10, %vm1114_vm9  ;;  %vm1120_vm4 = vcmp.eq.s32.totalorder %v2023_v60, %v1090_v34  ;;  %vm1122_vm2 = vcmp.eq.s32.totalorder %v2026_v61, %v1090_v34 }
 0x304   : > { %v1111_v35 = vrot.slane %v1110_v32, 1  ;;  %vm1655_vm8 = vmpackc.low %vm1120_vm4, %vm1118_vm3 }
 0x306   : > { %vm1112_vm7 = vcmp.lt.s32.totalorder %v1110_v32, %v1111_v35 }
 0x307   : > { %v1113_v36 = vsel %vm1112_vm7, %v1110_v32, %v1111_v35 }
 0x308   : > { %vm1115_vm11 = vcmp.eq.s32.totalorder %v2014_v44, %v1113_v36  ;;  %vm1117_vm12 = vcmp.eq.s32.totalorder %v2017_v52, %v1113_v36  ;;  %vm1119_vm13 = vcmp.eq.s32.totalorder %v2020_v55, %v1113_v36  ;;  %vm1121_vm14 = vcmp.eq.s32.totalorder %v2023_v60, %v1113_v36 }
 0x309   : > { %vm1649_vm15 = vmpackc.low %vm1117_vm12, %vm1115_vm11  ;;  %vm1123_vm5 = vcmp.eq.s32.totalorder %v2026_v61, %v1113_v36  ;;  %vm1125_vm6 = vcmp.eq.s32.totalorder %v2029_v62, %v1113_v36  ;;  %vm1124_vm11 = vcmp.eq.s32.totalorder %v2029_v62, %v1090_v34  ;;  %vm1127_vm9 = vcmp.eq.s32.totalorder %v2032_v63, %v1113_v36  ;;  %v1268_v61 = vld [vmem:[%s2145_s8] sm:$0xf]  ;;  %v1273_v62 = vpop.permute.xlu0 %1272 }
 0x30a   : > { %1650 = vmatprep.subr.msk.bf16.mxu1 %vm1649_vm15, %v1735_v37  ;;  %vm1653_vm1 = vmpackc.low %vm1121_vm14, %vm1119_vm13  ;;  %vm1129_vm10 = vcmp.eq.s32.totalorder %v2035_v1, %v1113_v36  ;;  %vm1126_vm14 = vcmp.eq.s32.totalorder %v2032_v63, %v1090_v34  ;;  %vm1128_vm15 = vcmp.eq.s32.totalorder %v2035_v1, %v1090_v34 }
 0x30b   : > { %1652 = vmatpush1.bf16.msk.msra.mxu1 %vm1651_vm0, %v1735_v37  ;;  %vm1657_vm7 = vmpackc.low %vm1125_vm6, %vm1123_vm5 }
 0x30c   : > { %1654 = vmatprep.subr.msk.bf16.mxu1 %vm1653_vm1, %v1735_v37  ;;  %vm1659_vm12 = vmpackc.low %vm1124_vm11, %vm1122_vm2  ;;  %vm1166_vm1 = vcmask 523264   ;;  %vm2151_vm2 = vcmask 261120  }
 0x30d   : > { %vm1661_vm13 = vmpackc.low %vm1129_vm10, %vm1127_vm9 }
 0x30e   : > { %vm1663_vm0 = vmpackc.low %vm1128_vm15, %vm1126_vm14 }
 0x30f   : > { %1656 = vmatpush1.bf16.msk.msra.mxu1 %vm1655_vm8, %v1735_v37 }
 0x310   : > { %1658 = vmatprep.subr.msk.bf16.mxu1 %vm1657_vm7, %v1735_v37 }
 0x313   : > { %1660 = vmatpush1.bf16.msk.msra.mxu1 %vm1659_vm12, %v1735_v37 }
 0x314   : > { %1662 = vmatprep.subr.msk.bf16.mxu1 %vm1661_vm13, %v1735_v37 }
 0x317   : > { %1664 = vmatpush1.bf16.msk.msra.mxu1 %vm1663_vm0, %v1735_v37 }
 0x31a   : > { %1622 = vmatmul.mubr.msk.f32.vlgmr.msra.gmra.mrb[12].mxu1 %vm1166_vm1, %v1162_v38 }
 0x31b   : > { %1249 = vmatprep.mubr.f32.mxu1 %v1733_v0 }
 0x31e   : > { %1623 = vmatmul.mubr.msk.f32.gmra.mrb[14].mxu1 %vm1166_vm1, %v1163_v39 }
 0x31f   : > { %1255 = vmatprep.mubr.f32.mxu1 %v1733_v0 }
 0x322   : > { %1624 = vmatmul.mubr.msk.f32.gmra.mrb[16].mxu1 %vm1166_vm1, %v1164_v40 }
 0x323   : > { %1261 = vmatprep.mubr.f32.mxu1 %v1733_v0 }
 0x326   : > { %1625 = vmatmul.mubr.msk.f32.gmra.mrb[18].mxu1 %vm1166_vm1, %v1165_v41 }
 0x327   : > { %1342 = vmatprep.mubr.f32.mxu1 %v1733_v0 }
 0x3ed   : > { %v1245_v42 = vpop.f32.mrb[12].mxu1 }
 0x3ee   : > { %1364 = vst [vmem:[%s498_s15] sm:$0xff] %v1245_v42  ;;  %v1247_v44 = vpop.f32.mrb[13].mxu1 }
 0x3ef   : > { %1365 = vst [vmem:[%s498_s15 + $0x8] sm:$0xff] %v1247_v44 }
 0x3f1   : > { %v1251_v47 = vpop.f32.mrb[14].mxu1 }
 0x3f2   : > { %v1667_v49 = vpack.c.bf16 %v1251_v47, %v1245_v42  ;;  %1366 = vst [vmem:[%s498_s15 + $0x10] sm:$0xff] %v1251_v47  ;;  %v1253_v50 = vpop.f32.mrb[15].mxu1 }
 0x3f3   : > { %v1665_v51 = vpack.c.bf16 %v1253_v50, %v1247_v44  ;;  %1367 = vst [vmem:[%s498_s15 + $0x18] sm:$0xff] %v1253_v50 }
 0x3f5   : > { %v1257_v52 = vpop.f32.mrb[16].mxu1  ;;  %1666 = vmatprep.subr.bf16.mxu1 %v1665_v51 }
 0x3f6   : > { %1368 = vst [vmem:[%s498_s15 + $0x20] sm:$0xff] %v1257_v52  ;;  %v1259_v53 = vpop.f32.mrb[17].mxu1  ;;  %1668 = vmatpush1.bf16.msra.mxu1 %v1667_v49 }
 0x3f7   : > { %1369 = vst [vmem:[%s498_s15 + $0x28] sm:$0xff] %v1259_v53 }
 0x3f9   : > { %v1263_v0 = vpop.f32.mrb[18].mxu1 }
 0x3fa   : > { %v1671_v54 = vpack.c.bf16 %v1263_v0, %v1257_v52  ;;  %1370 = vst [vmem:[%s498_s15 + $0x30] sm:$0xff] %v1263_v0  ;;  %v1265_v55 = vpop.f32.mrb[19].mxu1 }
 0x3fb   : > { %v1669_v60 = vpack.c.bf16 %v1265_v55, %v1259_v53  ;;  %1371 = vst [vmem:[%s498_s15 + $0x38] sm:$0xff] %v1265_v55 }
 0x3fd   : > { %1670 = vmatprep.subr.bf16.mxu1 %v1669_v60 }
 0x3fe   : > { %1672 = vmatpush1.bf16.msra.mxu1 %v1671_v54 }
 0x401   : > { %1626 = vmatmul.mubr.msk.f32.vlgmr.msra.gmra.mrb[20].mxu1 %vm2151_vm2, %v1268_v61 }
 0x4d4   : > { %v1344_v63 = vpop.f32.mrb[20].mxu1 }
 0x4d5   : > { %v1345_v1 = vadd.f32 %v1344_v63, %v1273_v62  ;;  %v1346_v2 = vpop.f32.mrb[21].mxu1 }
 0x4d6   : > { %v1347_v3 = vadd.f32 %v1346_v2, %v1273_v62 }
 0x4d7   : > { %1705 = vtanh.f32 %v1345_v1 }
 0x4d8   : > { %1707 = vtanh.f32 %v1347_v3 }
 0x4e1   : > { %v1706_v6 = vpop.eup %1705 }
 0x4e2   : > { %v1708_v7 = vpop.eup %1707 }
 0x4e3   : > { %v1353_v8 = vcombine.low %v1706_v6, %v1708_v7 }
 0x4e5   : > { %1355 = vst [vmem:[%s478_s19] sm:$0xff] %v1353_v8 }
 0x4e6 PF: > { %s23_s23 = sadd.s32 1, %s1731_s23   ;;  %s2152_s21 = smov %s1727_s22 }
 0x4e7   : > { %p20_p5 = scmp.ge.s32.totalorder %s23_s23, 4   ;;  %s2153_s22 = smov %s2155_s24 }
 0x4e9   :  { %22 = sbr.rel (!%p20_p5) target bundleno = 2 (0x2), region = 114 }

</bundles_post_ra>
